<compile_context>
chip_gen: v6e
topology: v6e:2x2x1
jax: 0.10.0
libtpu: 0.0.40
codegen_flags: <defaults>
</compile_context>

<pallas_src>
import functools

import jax
import jax.numpy as jnp
from jax.experimental import pallas as pl
from jax.experimental.pallas import tpu as pltpu

STABILITY_OFFSET = 1e-10


def _round_up(x, m):
    return ((x + m - 1) // m) * m


def _cdiv(a, b):
    return -(-a // b)


def _pick_tm(N, tm_max):
    """Largest lane-tile (multiple of 128, <= tm_max) that still yields >= 2
    grid steps when the problem is big enough (keeps both v7x TCs fed)."""
    target_steps = max(2, _cdiv(N, tm_max))
    tm = max(128, _round_up(_cdiv(N, target_steps), 128))
    return min(tm, max(128, tm_max))


def _s2_kernel(w_ref, x_ref, pss_ref, o_ref, *, neg_inv_two_sigma_sq, activation):
    w = w_ref[...]                    # (Pp, Kp)  matmul dtype (f32 or bf16)
    x = x_ref[...]                    # (Kp, tm)  matmul dtype
    pss = pss_ref[...]                # (Pp, 1)   f32

    # grouped conv summed over orientations == Wmat @ XT (MXU, f32 accumulate)
    conv = jnp.dot(w, x, preferred_element_type=jnp.float32)     # (Pp, tm)
    # uniform conv of sum_o c1^2 == column-wise sum of squared window values
    xf = x.astype(jnp.float32)
    xsq = jnp.sum(xf * xf, axis=0, keepdims=True)                # (1, tm)

    dist = xsq - 2.0 * conv + pss                                # (Pp, tm)
    if activation == "gaussian":
        out = jnp.exp(neg_inv_two_sigma_sq * dist)
    elif activation == "euclidean":
        out = -jnp.sqrt(jnp.maximum(dist, 0.0) + STABILITY_OFFSET)
    else:
        raise ValueError("activation must be 'gaussian' or 'euclidean'")
    o_ref[...] = out.astype(o_ref.dtype)


def _im2col_nchw_T(c1, size, pad):
    """c1: (B, O, H, W) -> XT (O*size*size, B*Hout*Wout), plus (Hout, Wout).

    Row index of XT is ordered (o, ky, kx) to match patches.reshape(P, O*s*s);
    column index is (b, h, w) row-major."""
    B, O, H, W = c1.shape
    Hout = H + 2 * pad - size + 1
    Wout = W + 2 * pad - size + 1
    xp = jnp.pad(c1, ((0, 0), (0, 0), (pad, pad), (pad, pad)))
    cols = []
    for ky in range(size):
        for kx in range(size):
            cols.append(xp[:, :, ky:ky + Hout, kx:kx + Wout])
    X = jnp.stack(cols, axis=0)                 # (size*size, B, O, Hout, Wout)
    X = X.transpose(2, 0, 1, 3, 4)              # (O, size*size, B, Hout, Wout)
    return X.reshape(O * size * size, B * Hout * Wout), Hout, Wout


def _s2_matmul(XT, Wmat, pss, *, sigma, activation, matmul_dtype, tm_max):
    """XT (K, N), Wmat (P, K), pss (P,) -> (P, N) activations."""
    K, N = XT.shape
    P = Wmat.shape[0]
    itemsize = jnp.dtype(matmul_dtype).itemsize

    Kp = _round_up(K, 128)   # lane dim of W / sublane dim of XT
    Pp = _round_up(P, 8)     # sublane dim of output: P=8 -> zero padding

    # Cap the lane-tile so double-buffered XT + out tiles (plus tiny Wmat/pss)
    # stay comfortably under v5e's 16 MiB scoped-VMEM default (v6e/v7x have
    # more headroom); avoids needing vmem_limit_bytes overrides.
    bytes_per_col = 2 * (Kp * itemsize + Pp * 4)
    tm_cap = max(128, ((8 * 1024 * 1024) // max(bytes_per_col, 1)) // 128 * 128)
    tm = _pick_tm(N, min(tm_max, tm_cap))

    Np = _round_up(N, tm)
    grid = Np // tm

    Xp = jnp.pad(XT, ((0, Kp - K), (0, Np - N))).astype(matmul_dtype)
    Wp = jnp.pad(Wmat, ((0, Pp - P), (0, Kp - K))).astype(matmul_dtype)
    pssp = jnp.pad(pss[:, None], ((0, Pp - P), (0, 0))).astype(jnp.float32)

    kernel = functools.partial(
        _s2_kernel,
        neg_inv_two_sigma_sq=-1.0 / (2.0 * float(sigma) ** 2),
        activation=activation,
    )

    cost = pl.CostEstimate(
        flops=2 * N * K * P,
        transcendentals=N * P,
        bytes_accessed=(Xp.size + Wp.size) * itemsize + (pssp.size + Pp * Np) * 4,
    )

    out = pl.pallas_call(
        kernel,
        out_shape=jax.ShapeDtypeStruct((Pp, Np), jnp.float32),
        grid_spec=pltpu.PrefetchScalarGridSpec(
            num_scalar_prefetch=0,
            grid=(grid,),
            in_specs=[
                pl.BlockSpec((Pp, Kp), lambda i: (0, 0)),   # Wmat (resident)
                pl.BlockSpec((Kp, tm), lambda i: (0, i)),   # XT tile
                pl.BlockSpec((Pp, 1), lambda i: (0, 0)),    # pss (resident)
            ],
            out_specs=pl.BlockSpec((Pp, tm), lambda i: (0, i)),
        ),
        compiler_params=pltpu.CompilerParams(dimension_semantics=("parallel",)),
        cost_estimate=cost,
    )(Wp, Xp, pssp)

    return out[:P, :N]


def s2_forward(c1_outputs, patches, *, sigma=1.0, activation="gaussian",
               matmul_dtype=jnp.float32, tm_max=4096):
    """Mirrors S2.forward: list of NCHW tensors in, list of (B, P, Hout, Wout) out.

    All scales are fused into a single pallas_call (same K / Wmat / pss) by
    concatenating their im2col column blocks along N."""
    P, O, size, _ = patches.shape
    pad = size // 2
    K = O * size * size

    xts, metas = [], []
    for c1 in c1_outputs:
        assert c1.shape[1] == O
        XT, Hout, Wout = _im2col_nchw_T(c1.astype(jnp.float32), size, pad)
        xts.append(XT)
        metas.append((c1.shape[0], Hout, Wout))
    XT = jnp.concatenate(xts, axis=1) if len(xts) > 1 else xts[0]

    Wmat = patches.reshape(P, K).astype(jnp.float32)
    pss = jnp.sum(patches.astype(jnp.float32) ** 2, axis=(1, 2, 3))

    out_flat = _s2_matmul(XT, Wmat, pss, sigma=sigma, activation=activation,
                          matmul_dtype=matmul_dtype, tm_max=tm_max)   # (P, N)

    outs, off = [], 0
    for (B, Hout, Wout) in metas:
        n_i = B * Hout * Wout
        o = out_flat[:, off:off + n_i].reshape(P, B, Hout, Wout)
        outs.append(o.transpose(1, 0, 2, 3))    # (B, P, Hout, Wout)
        off += n_i
    return outs


# ----------------------- pure-JAX reference for checking -----------------------
def s2_reference_single(c1, patches, sigma=1.0, activation="gaussian"):
    B, O, H, W = c1.shape
    P, _, size, _ = patches.shape
    pad = size // 2
    w = jnp.transpose(patches, (1, 0, 2, 3)).reshape(O * P, 1, size, size)
    conv = jax.lax.conv_general_dilated(
        c1, w, (1, 1), [(pad, pad), (pad, pad)],
        dimension_numbers=("NCHW", "OIHW", "NCHW"), feature_group_count=O)
    S = conv.shape[-1]
    conv = conv.reshape(B, O, P, S, S).sum(axis=1)
    csq = jnp.sum(c1 ** 2, axis=1, keepdims=True)
    ones = jnp.ones((1, 1, size, size), dtype=c1.dtype)
    csq = jax.lax.conv_general_dilated(
        csq, ones, (1, 1), [(pad, pad), (pad, pad)],
        dimension_numbers=("NCHW", "OIHW", "NCHW"))
    pss = jnp.sum(patches ** 2, axis=(1, 2, 3))
    dist = csq - 2.0 * conv + pss[None, :, None, None]
    if activation == "gaussian":
        return jnp.exp(-1.0 / (2.0 * sigma ** 2) * dist)
    return -jnp.sqrt(jnp.maximum(dist, 0.0) + STABILITY_OFFSET)


if __name__ == "__main__":
    key = jax.random.PRNGKey(0)
    k_p, k_c1a, k_c1b = jax.random.split(key, 3)

    num_patches, num_orientations, size = 8, 4, 5
    # Deterministic synthetic "precomputed patches" (module would load them).
    patches = 0.1 * jax.random.normal(
        k_p, (num_patches, num_orientations, size, size), dtype=jnp.float32)

    # c1_outputs: list of NCHW tensors at two spatial scales.
    c1_outputs = [
        0.1 * jax.random.normal(k_c1a, (2, num_orientations, 16, 16), dtype=jnp.float32),
        0.1 * jax.random.normal(k_c1b, (2, num_orientations, 12, 12), dtype=jnp.float32),
    ]

    # f32 matmul path, both activations: strict check against f32 reference.
    for act in ("gaussian", "euclidean"):
        fwd = jax.jit(functools.partial(s2_forward, sigma=1.0, activation=act))
        outs = fwd(c1_outputs, patches)
        outs = [jax.block_until_ready(o) for o in outs]
        for c1, o in zip(c1_outputs, outs):
            ref = s2_reference_single(c1, patches, sigma=1.0, activation=act)
            assert o.shape == ref.shape, (o.shape, ref.shape)
            assert jnp.allclose(o, ref, rtol=1e-3, atol=1e-4), \
                (act, float(jnp.max(jnp.abs(o - ref))))

    # bf16 matmul inputs with f32 accumulation: looser tolerance for bf16 rounding.
    fwd_bf16 = jax.jit(functools.partial(
        s2_forward, sigma=1.0, activation="gaussian", matmul_dtype=jnp.bfloat16))
    outs_bf16 = fwd_bf16(c1_outputs, patches)
    outs_bf16 = [jax.block_until_ready(o) for o in outs_bf16]
    for c1, o in zip(c1_outputs, outs_bf16):
        ref = s2_reference_single(c1, patches, sigma=1.0, activation="gaussian")
        assert jnp.allclose(o, ref, rtol=5e-2, atol=5e-3), \
            float(jnp.max(jnp.abs(o - ref)))

    print("KERNEL_OK")
</pallas_src>

<mosaic_0001>
module attributes {stable_mosaic.version = 11 : i64} {
  func.func @_s2_kernel(%arg0: i32, %arg1: memref<8x128xf32, #tpu.memory_space<vmem>>, %arg2: memref<128x512xf32, #tpu.memory_space<vmem>>, %arg3: memref<8x1xf32, #tpu.memory_space<vmem>>, %arg4: memref<8x512xf32, #tpu.memory_space<vmem>>) attributes {dimension_semantics = [#tpu.dimension_semantics<parallel>], iteration_bounds = array<i64: 2>, scalar_prefetch = 0 : i64, scratch_operands = 0 : i64, tpu.core_type = #tpu.core_type<tc>, window_params = [{pipeline_mode = #tpu.pipeline_mode<synchronous>, transform_indices = @transform_0, window_bounds = array<i64: 8, 128>}, {transform_indices = @transform_1, window_bounds = array<i64: 128, 512>}, {pipeline_mode = #tpu.pipeline_mode<synchronous>, transform_indices = @transform_2, window_bounds = array<i64: 8, 1>}, {transform_indices = @transform_3, window_bounds = array<i64: 8, 512>}]} {
    %c0 = arith.constant 0 : index
    %c0_0 = arith.constant 0 : index
    %0 = vector.load %arg1[%c0, %c0_0] : memref<8x128xf32, #tpu.memory_space<vmem>>, vector<8x128xf32>
    %c0_1 = arith.constant 0 : index
    %c0_2 = arith.constant 0 : index
    %1 = vector.load %arg2[%c0_1, %c0_2] : memref<128x512xf32, #tpu.memory_space<vmem>>, vector<128x512xf32>
    %c0_3 = arith.constant 0 : index
    %c0_4 = arith.constant 0 : index
    %2 = vector.load %arg3[%c0_3, %c0_4] : memref<8x1xf32, #tpu.memory_space<vmem>>, vector<8x1xf32>
    %cst = arith.constant dense<0.000000e+00> : vector<8x512xf32>
    %3 = tpu.matmul %0, %1, %cst {dimension_numbers = #tpu.dot_dimension_numbers<[1], [0], [0], [1], [0, 0, 1, 1], [], []>} : vector<8x128xf32>, vector<128x512xf32>, vector<8x512xf32> -> vector<8x512xf32>
    %4 = arith.mulf %1, %1 : vector<128x512xf32>
    %cst_5 = arith.constant dense<0.000000e+00> : vector<512xf32>
    %5 = vector.multi_reduction <add>, %4, %cst_5 [0] : vector<128x512xf32> to vector<512xf32>
    %6 = vector.shape_cast %5 : vector<512xf32> to vector<1x512xf32>
    %cst_6 = arith.constant 2.000000e+00 : f32
    %7 = vector.broadcast %cst_6 : f32 to vector<8x512xf32>
    %8 = arith.mulf %7, %3 : vector<8x512xf32>
    %9 = vector.broadcast %6 : vector<1x512xf32> to vector<8x512xf32>
    %10 = arith.subf %9, %8 : vector<8x512xf32>
    %11 = vector.broadcast %2 : vector<8x1xf32> to vector<8x512xf32>
    %12 = arith.addf %10, %11 : vector<8x512xf32>
    %cst_7 = arith.constant -5.000000e-01 : f32
    %13 = vector.broadcast %cst_7 : f32 to vector<8x512xf32>
    %14 = arith.mulf %13, %12 : vector<8x512xf32>
    %15 = math.exp %14 : vector<8x512xf32>
    %c0_8 = arith.constant 0 : index
    %c0_9 = arith.constant 0 : index
    %16 = vector.load %arg4[%c0_8, %c0_9] : memref<8x512xf32, #tpu.memory_space<vmem>>, vector<8x512xf32>
    tpu.vector_store %arg4[%c0_8, %c0_9], %15 {strides = array<i32>} : memref<8x512xf32, #tpu.memory_space<vmem>>, vector<8x512xf32>,
    return
  }
  func.func @transform_0(%arg0: i32) -> (i32, i32) {
    %c0_i32 = arith.constant 0 : i32
    %c0_i32_0 = arith.constant 0 : i32
    %c0_i32_1 = arith.constant 0 : i32
    return %c0_i32, %c0_i32_0 : i32, i32
  }
  func.func @transform_1(%arg0: i32) -> (i32, i32) {
    %c0_i32 = arith.constant 0 : i32
    %c0_i32_0 = arith.constant 0 : i32
    return %c0_i32, %arg0 : i32, i32
  }
  func.func @transform_2(%arg0: i32) -> (i32, i32) {
    %c0_i32 = arith.constant 0 : i32
    %c0_i32_0 = arith.constant 0 : i32
    %c0_i32_1 = arith.constant 0 : i32
    return %c0_i32, %c0_i32_0 : i32, i32
  }
  func.func @transform_3(%arg0: i32) -> (i32, i32) {
    %c0_i32 = arith.constant 0 : i32
    %c0_i32_0 = arith.constant 0 : i32
    return %c0_i32, %arg0 : i32, i32
  }
}

</mosaic_0001>

<bundles_post_ra>
// kernel: s2_forward.1
= control target key start
LH: loop header
LB: loop body
LE: loop exit
PB: predicated region body
PF: predicated region fallthrough
CT: control target
= control target key end

     0   :  { %s865_s12 = smov 0   ;;  %s867_s13 = smov 0   ;;  %s1336_s0 = inlined_call_operand.vmem [shape: f32[8,128], index: 0, kind: input, shape index: {}]   ;;  %s1337_s1 = inlined_call_operand.vmem [shape: f32[128,1024], index: 1, kind: input, shape index: {}]   ;;  %s1338_s2 = inlined_call_operand.vmem [shape: f32[8,1], index: 2, kind: input, shape index: {}]   ;;  %s1339_s3 = inlined_call_operand.vmem [shape: f32[8,1024], index: 3, kind: output, shape index: {}]  }
   0x1   :  { %s869_s14 = smov 0  }
   0x2 LB: > { %s770_s15 = sadd.s32 4294967295, %s841_s14   ;;  %s882_s16 = sadd.s32 1, %s841_s14   ;;  %s841_s14 = sphi %s869_s14, %s1423_s14   ;;  %s837_s13 = sphi %s867_s13, %s1422_s13   ;;  %s833_s12 = sphi %s865_s12, %s1421_s12  }
   0x3   : > { %s38_s17 = ssub.s32 %s841_s14, %s882_s16  ;;  %s41_s18 = sadd.s32 1, %s837_s13 }
   0x4   : > { %p39_p0 = scmp.eq.s32.totalorder %s38_s17, 0  ;;  %p48_p1 = scmp.ne.s32.totalorder %s837_s13, %s833_s12 }
   0x5   : > { %p49_p2 = scmp.eq.s32.totalorder %s841_s14, 0  ;;  %p773_p4 = scmp.ge.s32.totalorder %s841_s14, 2 }
   0x6   : > { %s891_s19 = scalar_select %p39_p0, %s837_s13, %s41_s18  }
   0x7   : > { %p50_p3 = por %p49_p2, %p48_p1  ;;  %127 = sbr.rel (%p773_p4) target bundleno = 48 (0x30), region = 24 }
   0xc   : > { %130 = sbr.rel (!%p50_p3) target bundleno = 48 (0x30), region = 28  ;;  %s132_s20 = sand.u32 (%p50_p3), 1, %s837_s13  }
   0xd   : > { %s783_s21 = sshll.u32 (%p50_p3), %s841_s14, 5  ;;  %s774_s22 = sshll.u32 (%p50_p3), %s132_s20, 9 }
   0xe   : > { %s899_s25 = scalar_lea.vmem (%p50_p3), %s1337_s1, %s783_s21  ;;  %s904_s26 = scalar_lea.vmem (%p50_p3), [#allocation2], %s774_s22 }
   0xf   : > { %v150_v0 = vld [vmem:[%s899_s25] sm:$0xff] (%p50_p3)  ;;  %v152_v1 = vld [vmem:[%s899_s25 + $0x8] sm:$0xff] (%p50_p3)  ;;  %v154_v2 = vld [vmem:[%s899_s25 + $0x10] sm:$0xff] (%p50_p3) }
  0x10   : > { %151 = vst [vmem:[%s904_s26] sm:$0xff] (%p50_p3), %v150_v0  ;;  %153 = vst [vmem:[%s904_s26 + $0x8] sm:$0xff] (%p50_p3), %v152_v1  ;;  %v156_v3 = vld [vmem:[%s899_s25 + $0x18] sm:$0xff] (%p50_p3)  ;;  %v158_v4 = vld [vmem:[%s899_s25 + $0x40] sm:$0xff] (%p50_p3) }
  0x11   : > { %155 = vst [vmem:[%s904_s26 + $0x10] sm:$0xff] %v154_v2  ;;  %v160_v5 = vld [vmem:[%s899_s25 + $0x48] sm:$0xff]  ;;  %157 = vst [vmem:[%s904_s26 + $0x18] sm:$0xff] %v156_v3  ;;  %v162_v6 = vld [vmem:[%s899_s25 + $0x50] sm:$0xff] }
  0x12   : > { %159 = vst [vmem:[%s904_s26 + $0x20] sm:$0xff] %v158_v4  ;;  %161 = vst [vmem:[%s904_s26 + $0x28] sm:$0xff] %v160_v5  ;;  %v164_v7 = vld [vmem:[%s899_s25 + $0x58] sm:$0xff]  ;;  %v166_v8 = vld [vmem:[%s899_s25 + $0x80] sm:$0xff] }
  0x13   : > { %163 = vst [vmem:[%s904_s26 + $0x30] sm:$0xff] %v162_v6  ;;  %165 = vst [vmem:[%s904_s26 + $0x38] sm:$0xff] %v164_v7  ;;  %v168_v9 = vld [vmem:[%s899_s25 + $0x88] sm:$0xff]  ;;  %v170_v10 = vld [vmem:[%s899_s25 + $0x90] sm:$0xff] }
  0x14   : > { %167 = vst [vmem:[%s904_s26 + $0x40] sm:$0xff] %v166_v8  ;;  %v172_v11 = vld [vmem:[%s899_s25 + $0x98] sm:$0xff]  ;;  %169 = vst [vmem:[%s904_s26 + $0x48] sm:$0xff] %v168_v9  ;;  %v174_v12 = vld [vmem:[%s899_s25 + $0xc0] sm:$0xff] }
  0x15   : > { %171 = vst [vmem:[%s904_s26 + $0x50] sm:$0xff] %v170_v10  ;;  %173 = vst [vmem:[%s904_s26 + $0x58] sm:$0xff] %v172_v11  ;;  %v176_v13 = vld [vmem:[%s899_s25 + $0xc8] sm:$0xff]  ;;  %v178_v14 = vld [vmem:[%s899_s25 + $0xd0] sm:$0xff] }
  0x16   : > { %175 = vst [vmem:[%s904_s26 + $0x60] sm:$0xff] %v174_v12  ;;  %177 = vst [vmem:[%s904_s26 + $0x68] sm:$0xff] %v176_v13  ;;  %v180_v15 = vld [vmem:[%s899_s25 + $0xd8] sm:$0xff]  ;;  %v182_v16 = vld [vmem:[%s899_s25 + $0x100] sm:$0xff] }
  0x17   : > { %179 = vst [vmem:[%s904_s26 + $0x70] sm:$0xff] %v178_v14  ;;  %v184_v17 = vld [vmem:[%s899_s25 + $0x108] sm:$0xff]  ;;  %181 = vst [vmem:[%s904_s26 + $0x78] sm:$0xff] %v180_v15  ;;  %v186_v18 = vld [vmem:[%s899_s25 + $0x110] sm:$0xff] }
  0x18   : > { %183 = vst [vmem:[%s904_s26 + $0x80] sm:$0xff] %v182_v16  ;;  %185 = vst [vmem:[%s904_s26 + $0x88] sm:$0xff] %v184_v17  ;;  %v188_v19 = vld [vmem:[%s899_s25 + $0x118] sm:$0xff]  ;;  %v190_v20 = vld [vmem:[%s899_s25 + $0x140] sm:$0xff] }
  0x19   : > { %187 = vst [vmem:[%s904_s26 + $0x90] sm:$0xff] %v186_v18  ;;  %189 = vst [vmem:[%s904_s26 + $0x98] sm:$0xff] %v188_v19  ;;  %v192_v21 = vld [vmem:[%s899_s25 + $0x148] sm:$0xff]  ;;  %v194_v22 = vld [vmem:[%s899_s25 + $0x150] sm:$0xff] }
  0x1a   : > { %191 = vst [vmem:[%s904_s26 + $0xa0] sm:$0xff] %v190_v20  ;;  %v196_v23 = vld [vmem:[%s899_s25 + $0x158] sm:$0xff]  ;;  %193 = vst [vmem:[%s904_s26 + $0xa8] sm:$0xff] %v192_v21  ;;  %v198_v24 = vld [vmem:[%s899_s25 + $0x180] sm:$0xff] }
  0x1b   : > { %195 = vst [vmem:[%s904_s26 + $0xb0] sm:$0xff] %v194_v22  ;;  %197 = vst [vmem:[%s904_s26 + $0xb8] sm:$0xff] %v196_v23  ;;  %v200_v25 = vld [vmem:[%s899_s25 + $0x188] sm:$0xff]  ;;  %v202_v26 = vld [vmem:[%s899_s25 + $0x190] sm:$0xff] }
  0x1c   : > { %199 = vst [vmem:[%s904_s26 + $0xc0] sm:$0xff] %v198_v24  ;;  %201 = vst [vmem:[%s904_s26 + $0xc8] sm:$0xff] %v200_v25  ;;  %v204_v27 = vld [vmem:[%s899_s25 + $0x198] sm:$0xff]  ;;  %v206_v28 = vld [vmem:[%s899_s25 + $0x1c0] sm:$0xff] }
  0x1d   : > { %203 = vst [vmem:[%s904_s26 + $0xd0] sm:$0xff] %v202_v26  ;;  %v208_v29 = vld [vmem:[%s899_s25 + $0x1c8] sm:$0xff]  ;;  %205 = vst [vmem:[%s904_s26 + $0xd8] sm:$0xff] %v204_v27  ;;  %v210_v30 = vld [vmem:[%s899_s25 + $0x1d0] sm:$0xff] }
  0x1e   : > { %207 = vst [vmem:[%s904_s26 + $0xe0] sm:$0xff] %v206_v28  ;;  %209 = vst [vmem:[%s904_s26 + $0xe8] sm:$0xff] %v208_v29  ;;  %v212_v31 = vld [vmem:[%s899_s25 + $0x1d8] sm:$0xff]  ;;  %v214_v32 = vld [vmem:[%s899_s25 + $0x200] sm:$0xff] }
  0x1f   : > { %211 = vst [vmem:[%s904_s26 + $0xf0] sm:$0xff] %v210_v30  ;;  %213 = vst [vmem:[%s904_s26 + $0xf8] sm:$0xff] %v212_v31  ;;  %v216_v33 = vld [vmem:[%s899_s25 + $0x208] sm:$0xff]  ;;  %v218_v34 = vld [vmem:[%s899_s25 + $0x210] sm:$0xff] }
  0x20   : > { %215 = vst [vmem:[%s904_s26 + $0x100] sm:$0xff] %v214_v32  ;;  %v220_v35 = vld [vmem:[%s899_s25 + $0x218] sm:$0xff]  ;;  %217 = vst [vmem:[%s904_s26 + $0x108] sm:$0xff] %v216_v33  ;;  %v222_v36 = vld [vmem:[%s899_s25 + $0x240] sm:$0xff] }
  0x21   : > { %219 = vst [vmem:[%s904_s26 + $0x110] sm:$0xff] %v218_v34  ;;  %221 = vst [vmem:[%s904_s26 + $0x118] sm:$0xff] %v220_v35  ;;  %v224_v37 = vld [vmem:[%s899_s25 + $0x248] sm:$0xff]  ;;  %v226_v38 = vld [vmem:[%s899_s25 + $0x250] sm:$0xff] }
  0x22   : > { %223 = vst [vmem:[%s904_s26 + $0x120] sm:$0xff] %v222_v36  ;;  %225 = vst [vmem:[%s904_s26 + $0x128] sm:$0xff] %v224_v37  ;;  %v228_v39 = vld [vmem:[%s899_s25 + $0x258] sm:$0xff]  ;;  %v230_v40 = vld [vmem:[%s899_s25 + $0x280] sm:$0xff] }
  0x23   : > { %227 = vst [vmem:[%s904_s26 + $0x130] sm:$0xff] %v226_v38  ;;  %v232_v41 = vld [vmem:[%s899_s25 + $0x288] sm:$0xff]  ;;  %229 = vst [vmem:[%s904_s26 + $0x138] sm:$0xff] %v228_v39  ;;  %v234_v42 = vld [vmem:[%s899_s25 + $0x290] sm:$0xff] }
  0x24   : > { %231 = vst [vmem:[%s904_s26 + $0x140] sm:$0xff] %v230_v40  ;;  %233 = vst [vmem:[%s904_s26 + $0x148] sm:$0xff] %v232_v41  ;;  %v236_v43 = vld [vmem:[%s899_s25 + $0x298] sm:$0xff]  ;;  %v238_v44 = vld [vmem:[%s899_s25 + $0x2c0] sm:$0xff] }
  0x25   : > { %235 = vst [vmem:[%s904_s26 + $0x150] sm:$0xff] %v234_v42  ;;  %237 = vst [vmem:[%s904_s26 + $0x158] sm:$0xff] %v236_v43  ;;  %v240_v45 = vld [vmem:[%s899_s25 + $0x2c8] sm:$0xff]  ;;  %v242_v46 = vld [vmem:[%s899_s25 + $0x2d0] sm:$0xff] }
  0x26   : > { %239 = vst [vmem:[%s904_s26 + $0x160] sm:$0xff] %v238_v44  ;;  %v244_v47 = vld [vmem:[%s899_s25 + $0x2d8] sm:$0xff]  ;;  %241 = vst [vmem:[%s904_s26 + $0x168] sm:$0xff] %v240_v45  ;;  %v246_v48 = vld [vmem:[%s899_s25 + $0x300] sm:$0xff] }
  0x27   : > { %243 = vst [vmem:[%s904_s26 + $0x170] sm:$0xff] %v242_v46  ;;  %245 = vst [vmem:[%s904_s26 + $0x178] sm:$0xff] %v244_v47  ;;  %v248_v49 = vld [vmem:[%s899_s25 + $0x308] sm:$0xff]  ;;  %v250_v50 = vld [vmem:[%s899_s25 + $0x310] sm:$0xff] }
  0x28   : > { %247 = vst [vmem:[%s904_s26 + $0x180] sm:$0xff] %v246_v48  ;;  %249 = vst [vmem:[%s904_s26 + $0x188] sm:$0xff] %v248_v49  ;;  %v252_v51 = vld [vmem:[%s899_s25 + $0x318] sm:$0xff]  ;;  %v254_v52 = vld [vmem:[%s899_s25 + $0x340] sm:$0xff] }
  0x29   : > { %251 = vst [vmem:[%s904_s26 + $0x190] sm:$0xff] %v250_v50  ;;  %v256_v53 = vld [vmem:[%s899_s25 + $0x348] sm:$0xff]  ;;  %253 = vst [vmem:[%s904_s26 + $0x198] sm:$0xff] %v252_v51  ;;  %v258_v54 = vld [vmem:[%s899_s25 + $0x350] sm:$0xff] }
  0x2a   : > { %255 = vst [vmem:[%s904_s26 + $0x1a0] sm:$0xff] %v254_v52  ;;  %257 = vst [vmem:[%s904_s26 + $0x1a8] sm:$0xff] %v256_v53  ;;  %v260_v55 = vld [vmem:[%s899_s25 + $0x358] sm:$0xff]  ;;  %v262_v56 = vld [vmem:[%s899_s25 + $0x380] sm:$0xff] }
  0x2b   : > { %259 = vst [vmem:[%s904_s26 + $0x1b0] sm:$0xff] %v258_v54  ;;  %261 = vst [vmem:[%s904_s26 + $0x1b8] sm:$0xff] %v260_v55  ;;  %v264_v57 = vld [vmem:[%s899_s25 + $0x388] sm:$0xff]  ;;  %v266_v58 = vld [vmem:[%s899_s25 + $0x390] sm:$0xff] }
  0x2c   : > { %263 = vst [vmem:[%s904_s26 + $0x1c0] sm:$0xff] %v262_v56  ;;  %v268_v59 = vld [vmem:[%s899_s25 + $0x398] sm:$0xff]  ;;  %265 = vst [vmem:[%s904_s26 + $0x1c8] sm:$0xff] %v264_v57  ;;  %v270_v60 = vld [vmem:[%s899_s25 + $0x3c0] sm:$0xff] }
  0x2d   : > { %267 = vst [vmem:[%s904_s26 + $0x1d0] sm:$0xff] %v266_v58  ;;  %269 = vst [vmem:[%s904_s26 + $0x1d8] sm:$0xff] %v268_v59  ;;  %v272_v61 = vld [vmem:[%s899_s25 + $0x3c8] sm:$0xff]  ;;  %v274_v62 = vld [vmem:[%s899_s25 + $0x3d0] sm:$0xff] }
  0x2e   : > { %271 = vst [vmem:[%s904_s26 + $0x1e0] sm:$0xff] %v270_v60  ;;  %273 = vst [vmem:[%s904_s26 + $0x1e8] sm:$0xff] %v272_v61  ;;  %v276_v63 = vld [vmem:[%s899_s25 + $0x3d8] sm:$0xff] }
  0x2f   : > { %275 = vst [vmem:[%s904_s26 + $0x1f0] sm:$0xff] %v274_v62  ;;  %277 = vst [vmem:[%s904_s26 + $0x1f8] sm:$0xff] %v276_v63 }
  0x30 PF: > { %p777_p5 = scmp.ge.s32.totalorder %s841_s14, 1  ;;  %p282_p6 = scmp.lt.s32.totalorder %s841_s14, 3 }
  0x32   : > { %p283_p7 = pnand %p777_p5, %p282_p6 }
  0x34   : > { %286 = sbr.rel (%p283_p7) target bundleno = 316 (0x13c), region = 51 }
  0x39   : > { %s289_s27 = sand.u32 1, %s833_s12   ;;  %v384_v0 = vld [vmem:[%s1338_s2] sm:$0xff]  ;;  %v843_v1 = vmov 0.0   ;;  %v844_v2 = vmov 0   ;;  %s779_s7 = sshll.u32 %s770_s15, 2 }
  0x3a   : > { %s778_s30 = sshll.u32 %s289_s27, 9  ;;  %449 = vmatprep.mubr.f32.mxu0 %v843_v1  ;;  %520 = vmatprep.mubr.f32.mxu1 %v843_v1  ;;  %p314_p8 = scmp.lt.s32.totalorder %s779_s7, 7 }
  0x3b   : > { %810 = vset.pattern.permute.xlu0 %v844_v2  ;;  %s1037_s4 = scalar_lea.vmem [#allocation2], %s778_s30 }
  0x3c   : > { %v1040_v3 = vld [vmem:[%s1037_s4 + $0x1e8] sm:$0xff]  ;;  %v1043_v4 = vld [vmem:[%s1037_s4 + $0x1f8] sm:$0xff]  ;;  %v1046_v5 = vld [vmem:[%s1037_s4 + $0x1e0] sm:$0xff]  ;;  %685 = vperm.xlu0 %810, %v384_v0   ;;  %s1425_s7 = smov (!%p314_p8, %s779_s7), 7 }
  0x3d   : > { %1365 = vst [vmem:[#allocation3_spill] sm:$0xff] %v1040_v3  ;;  %1366 = vst [vmem:[#allocation4_spill] sm:$0xff] %v1043_v4  ;;  %385 = vmatprep.subr.mxu0 %v1040_v3  ;;  %456 = vmatprep.subr.mxu1 %v1043_v4  ;;  %v1051_v6 = vld [vmem:[%s1037_s4 + $0x1f0] sm:$0xff]  ;;  %v1054_v7 = vld [vmem:[%s1037_s4 + $0x1c8] sm:$0xff]  ;;  %s780_s8 = sshll.u32 %s1425_s7, 3 }
  0x3e   : > { %1367 = vst [vmem:[#allocation5_spill] sm:$0xff] %v1046_v5  ;;  %1368 = vst [vmem:[#allocation6_spill] sm:$0xff] %v1051_v6  ;;  %v1057_v8 = vld [vmem:[%s1037_s4 + $0x1d8] sm:$0xff]  ;;  %386 = vmatpush1.msra.mxu0 %v1046_v5  ;;  %457 = vmatpush1.msra.mxu1 %v1051_v6  ;;  %v1062_v9 = vld [vmem:[%s1037_s4 + $0x1c0] sm:$0xff]  ;;  %s317_s11 = scalar_lea.vmem %s1339_s3, %s780_s8 }
  0x3f   : > { %1369 = vst [vmem:[#allocation7_spill] sm:$0xff] %v1054_v7  ;;  %1370 = vst [vmem:[#allocation8_spill] sm:$0xff] %v1057_v8  ;;  %v1065_v10 = vld [vmem:[%s1037_s4 + $0x1d0] sm:$0xff]  ;;  %v1068_v11 = vld [vmem:[%s1037_s4 + $0x1a8] sm:$0xff]  ;;  %387 = vmatprep.subr.mxu0 %v1054_v7  ;;  %458 = vmatprep.subr.mxu1 %v1057_v8 }
  0x40   : > { %1371 = vst [vmem:[#allocation9_spill] sm:$0xff] %v1062_v9  ;;  %1372 = vst [vmem:[#allocation10_spill] sm:$0xff] %v1065_v10  ;;  %v1073_v12 = vld [vmem:[%s1037_s4 + $0x1b8] sm:$0xff]  ;;  %v1076_v13 = vld [vmem:[%s1037_s4 + $0x1a0] sm:$0xff]  ;;  %388 = vmatpush1.msra.mxu0 %v1062_v9  ;;  %459 = vmatpush1.msra.mxu1 %v1065_v10 }
  0x41   : > { %1373 = vst [vmem:[#allocation11_spill] sm:$0xff] %v1068_v11  ;;  %1374 = vst [vmem:[#allocation12_spill] sm:$0xff] %v1073_v12  ;;  %v1079_v14 = vld [vmem:[%s1037_s4 + $0x1b0] sm:$0xff]  ;;  %v1084_v15 = vld [vmem:[%s1037_s4 + $0x188] sm:$0xff]  ;;  %389 = vmatprep.subr.mxu0 %v1068_v11  ;;  %460 = vmatprep.subr.mxu1 %v1073_v12 }
  0x42   : > { %1375 = vst [vmem:[#allocation13_spill] sm:$0xff] %v1076_v13  ;;  %1376 = vst [vmem:[#allocation14_spill] sm:$0xff] %v1079_v14  ;;  %v1087_v16 = vld [vmem:[%s1037_s4 + $0x198] sm:$0xff]  ;;  %v1092_v17 = vld [vmem:[%s1037_s4 + $0x180] sm:$0xff]  ;;  %390 = vmatpush1.msra.mxu0 %v1076_v13  ;;  %461 = vmatpush1.msra.mxu1 %v1079_v14 }
  0x43   : > { %1377 = vst [vmem:[#allocation15_spill] sm:$0xff] %v1084_v15  ;;  %1378 = vst [vmem:[#allocation16_spill] sm:$0xff] %v1087_v16  ;;  %v1095_v18 = vld [vmem:[%s1037_s4 + $0x190] sm:$0xff]  ;;  %v1100_v19 = vld [vmem:[%s1037_s4 + $0x168] sm:$0xff]  ;;  %391 = vmatprep.subr.mxu0 %v1084_v15  ;;  %462 = vmatprep.subr.mxu1 %v1087_v16 }
  0x44   : > { %1379 = vst [vmem:[#allocation17_spill] sm:$0xff] %v1092_v17  ;;  %1380 = vst [vmem:[#allocation18_spill] sm:$0xff] %v1095_v18  ;;  %v1103_v20 = vld [vmem:[%s1037_s4 + $0x178] sm:$0xff]  ;;  %v1108_v21 = vld [vmem:[%s1037_s4 + $0x160] sm:$0xff]  ;;  %392 = vmatpush1.msra.mxu0 %v1092_v17  ;;  %463 = vmatpush1.msra.mxu1 %v1095_v18 }
  0x45   : > { %1381 = vst [vmem:[#allocation19_spill] sm:$0xff] %v1100_v19  ;;  %1382 = vst [vmem:[#allocation20_spill] sm:$0xff] %v1103_v20  ;;  %v1111_v22 = vld [vmem:[%s1037_s4 + $0x170] sm:$0xff]  ;;  %v1116_v23 = vld [vmem:[%s1037_s4 + $0x148] sm:$0xff]  ;;  %393 = vmatprep.subr.mxu0 %v1100_v19  ;;  %464 = vmatprep.subr.mxu1 %v1103_v20 }
  0x46   : > { %1383 = vst [vmem:[#allocation21_spill] sm:$0xff] %v1108_v21  ;;  %1384 = vst [vmem:[#allocation22_spill] sm:$0xff] %v1111_v22  ;;  %v1119_v24 = vld [vmem:[%s1037_s4 + $0x158] sm:$0xff]  ;;  %v1124_v25 = vld [vmem:[%s1037_s4 + $0x140] sm:$0xff]  ;;  %394 = vmatpush1.msra.mxu0 %v1108_v21  ;;  %465 = vmatpush1.msra.mxu1 %v1111_v22 }
  0x47   : > { %1385 = vst [vmem:[#allocation23_spill] sm:$0xff] %v1116_v23  ;;  %1386 = vst [vmem:[#allocation24_spill] sm:$0xff] %v1119_v24  ;;  %v1127_v26 = vld [vmem:[%s1037_s4 + $0x150] sm:$0xff]  ;;  %v1132_v27 = vld [vmem:[%s1037_s4 + $0x128] sm:$0xff]  ;;  %395 = vmatprep.subr.mxu0 %v1116_v23  ;;  %466 = vmatprep.subr.mxu1 %v1119_v24 }
  0x48   : > { %1387 = vst [vmem:[#allocation25_spill] sm:$0xff] %v1124_v25  ;;  %1388 = vst [vmem:[#allocation26_spill] sm:$0xff] %v1127_v26  ;;  %v1135_v28 = vld [vmem:[%s1037_s4 + $0x138] sm:$0xff]  ;;  %v1140_v29 = vld [vmem:[%s1037_s4 + $0x120] sm:$0xff]  ;;  %396 = vmatpush1.msra.mxu0 %v1124_v25  ;;  %467 = vmatpush1.msra.mxu1 %v1127_v26 }
  0x49   : > { %v1143_v30 = vld [vmem:[%s1037_s4 + $0x130] sm:$0xff]  ;;  %v353_v31 = vld [vmem:[%s1037_s4 + $0x108] sm:$0xff]  ;;  %v355_v32 = vld [vmem:[%s1037_s4 + $0x118] sm:$0xff]  ;;  %397 = vmatprep.subr.mxu0 %v1132_v27  ;;  %468 = vmatprep.subr.mxu1 %v1135_v28 }
  0x4a   : > { %1389 = vst [vmem:[#allocation27_spill] sm:$0xff] %v1143_v30  ;;  %v1150_v33 = vld [vmem:[%s1037_s4 + $0x100] sm:$0xff]  ;;  %v1153_v34 = vld [vmem:[%s1037_s4 + $0x110] sm:$0xff]  ;;  %v349_v35 = vld [vmem:[%s1037_s4 + $0xe8] sm:$0xff]  ;;  %398 = vmatpush1.msra.mxu0 %v1140_v29  ;;  %469 = vmatpush1.msra.mxu1 %v1143_v30  ;;  %v1164_v38 = vmul.f32 %v353_v31, %v353_v31  ;;  %v1171_v42 = vmul.f32 %v355_v32, %v355_v32 }
  0x4b   : > { %v351_v36 = vld [vmem:[%s1037_s4 + $0xf8] sm:$0xff]  ;;  %v1160_v37 = vld [vmem:[%s1037_s4 + $0xe0] sm:$0xff]  ;;  %v1167_v39 = vld [vmem:[%s1037_s4 + $0xf0] sm:$0xff]  ;;  %399 = vmatprep.subr.mxu0 %v353_v31  ;;  %470 = vmatprep.subr.mxu1 %v355_v32  ;;  %v1173_v43 = vmul.f32 %v349_v35, %v349_v35 }
  0x4c   : > { %1390 = vst [vmem:[#allocation28_spill] sm:$0xff] %v1164_v38  ;;  %v345_v40 = vld [vmem:[%s1037_s4 + $0xc8] sm:$0xff]  ;;  %v347_v41 = vld [vmem:[%s1037_s4 + $0xd8] sm:$0xff]  ;;  %1391 = vst [vmem:[#allocation29_spill] sm:$0xff] %v1171_v42  ;;  %v1175_v44 = vmul.f32 %v351_v36, %v351_v36  ;;  %400 = vmatpush1.msra.mxu0 %v1150_v33  ;;  %471 = vmatpush1.msra.mxu1 %v1153_v34 }
  0x4d   : > { %v1178_v45 = vld [vmem:[%s1037_s4 + $0xc0] sm:$0xff]  ;;  %v1181_v46 = vld [vmem:[%s1037_s4 + $0xd0] sm:$0xff]  ;;  %v341_v47 = vld [vmem:[%s1037_s4 + $0xa8] sm:$0xff]  ;;  %v1186_v48 = vmul.f32 %v345_v40, %v345_v40  ;;  %v1188_v49 = vmul.f32 %v347_v41, %v347_v41  ;;  %401 = vmatprep.subr.mxu0 %v349_v35  ;;  %472 = vmatprep.subr.mxu1 %v351_v36 }
  0x4e   : > { %1392 = vst [vmem:[#allocation30_spill] sm:$0xff] %v1175_v44  ;;  %v1190_v50 = vmul.f32 %v341_v47, %v341_v47  ;;  %v343_v51 = vld [vmem:[%s1037_s4 + $0xb8] sm:$0xff]  ;;  %v337_v52 = vld [vmem:[%s1037_s4 + $0x88] sm:$0xff]  ;;  %v340_v55 = vld [vmem:[%s1037_s4 + $0xa0] sm:$0xff]  ;;  %402 = vmatpush1.msra.mxu0 %v1160_v37  ;;  %473 = vmatpush1.msra.mxu1 %v1167_v39 }
  0x4f   : > { %v339_v53 = vld [vmem:[%s1037_s4 + $0x98] sm:$0xff]  ;;  %v1195_v54 = vmul.f32 %v343_v51, %v343_v51  ;;  %v1199_v56 = vld [vmem:[%s1037_s4 + $0xb0] sm:$0xff]  ;;  %v1201_v57 = vmul.f32 %v337_v52, %v337_v52  ;;  %v333_v59 = vld [vmem:[%s1037_s4 + $0x68] sm:$0xff]  ;;  %403 = vmatprep.subr.mxu0 %v345_v40  ;;  %474 = vmatprep.subr.mxu1 %v347_v41  ;;  %v547_v30 = vmul.f32 %v340_v55, %v340_v55 }
  0x50   : > { %v1203_v58 = vmul.f32 %v339_v53, %v339_v53  ;;  %v335_v60 = vld [vmem:[%s1037_s4 + $0x78] sm:$0xff]  ;;  %v329_v61 = vld [vmem:[%s1037_s4 + $0x48] sm:$0xff]  ;;  %v540_v62 = vmul.f32 %v333_v59, %v333_v59  ;;  %v328_v2 = vld [vmem:[%s1037_s4 + $0x40] sm:$0xff]  ;;  %404 = vmatpush1.msra.mxu0 %v1178_v45  ;;  %475 = vmatpush1.msra.mxu1 %v1181_v46 }
  0x51   : > { %v542_v63 = vmul.f32 %v335_v60, %v335_v60  ;;  %v536_v0 = vmul.f32 %v329_v61, %v329_v61  ;;  %v331_v1 = vld [vmem:[%s1037_s4 + $0x58] sm:$0xff]  ;;  %v1213_v31 = vld [vmem:[%s1037_s4 + $0x28] sm:$0xff]  ;;  %v336_v32 = vld [vmem:[%s1037_s4 + $0x80] sm:$0xff]  ;;  %v535_v4 = vmul.f32 %v328_v2, %v328_v2  ;;  %405 = vmatprep.subr.mxu0 %v341_v47  ;;  %476 = vmatprep.subr.mxu1 %v343_v51 }
  0x52   : > { %v338_v35 = vld [vmem:[%s1037_s4 + $0x90] sm:$0xff]  ;;  %v538_v36 = vmul.f32 %v331_v1, %v331_v1  ;;  %v532_v3 = vmul.f32 %v1213_v31, %v1213_v31  ;;  %v327_v8 = vld [vmem:[%s1037_s4 + $0x38] sm:$0xff]  ;;  %v324_v7 = vld [vmem:[%s1037_s4 + $0x20] sm:$0xff]  ;;  %406 = vmatpush1.msra.mxu0 %v340_v55  ;;  %477 = vmatpush1.msra.mxu1 %v1199_v56  ;;  %v543_v22 = vmul.f32 %v336_v32, %v336_v32 }
  0x53   : > { %v326_v12 = vld [vmem:[%s1037_s4 + $0x30] sm:$0xff]  ;;  %v534_v40 = vmul.f32 %v327_v8, %v327_v8  ;;  %v531_v41 = vmul.f32 %v324_v7, %v324_v7  ;;  %v321_v16 = vld [vmem:[%s1037_s4 + $0x8] sm:$0xff]  ;;  %v323_v15 = vld [vmem:[%s1037_s4 + $0x18] sm:$0xff]  ;;  %407 = vmatprep.subr.mxu0 %v337_v52  ;;  %478 = vmatprep.subr.mxu1 %v339_v53  ;;  %v545_v44 = vmul.f32 %v338_v35, %v338_v35 }
  0x54   : > { %v533_v11 = vmul.f32 %v326_v12, %v326_v12  ;;  %v1227_v20 = vld [vmem:[%s1037_s4] sm:$0xff]  ;;  %v330_v24 = vld [vmem:[%s1037_s4 + $0x50] sm:$0xff]  ;;  %v528_v23 = vmul.f32 %v321_v16, %v321_v16  ;;  %v530_v6 = vmul.f32 %v323_v15, %v323_v15  ;;  %408 = vmatpush1.msra.mxu0 %v336_v32  ;;  %479 = vmatpush1.msra.mxu1 %v338_v35  ;;  %v1398_v55 = vld [vmem:[#allocation26_spill] sm:$0xff] }
  0x55   : > { %v332_v19 = vld [vmem:[%s1037_s4 + $0x60] sm:$0xff]  ;;  %v527_v5 = vmul.f32 %v1227_v20, %v1227_v20  ;;  %v322_v10 = vld [vmem:[%s1037_s4 + $0x10] sm:$0xff]  ;;  %v537_v14 = vmul.f32 %v330_v24, %v330_v24  ;;  %409 = vmatprep.subr.mxu0 %v333_v59  ;;  %480 = vmatprep.subr.mxu1 %v335_v60 }
  0x56   : > { %v539_v9 = vmul.f32 %v332_v19, %v332_v19  ;;  %v529_v13 = vmul.f32 %v322_v10, %v322_v10  ;;  %v334_v18 = vld [vmem:[%s1037_s4 + $0x70] sm:$0xff]  ;;  %v612_v17 = vadd.f32 %v532_v3, %v528_v23  ;;  %v654_v47 = vadd.f32 %v534_v40, %v530_v6  ;;  %410 = vmatpush1.msra.mxu0 %v332_v19 }
  0x57   : > { %v591_v51 = vadd.f32 %v531_v41, %v527_v5  ;;  %v541_v21 = vmul.f32 %v334_v18, %v334_v18  ;;  %481 = vmatpush1.msra.mxu1 %v334_v18  ;;  %411 = vmatprep.subr.mxu0 %v329_v61  ;;  %v551_v23 = vmul.f32 %v1178_v45, %v1178_v45  ;;  %v1394_v45 = vld [vmem:[#allocation27_spill] sm:$0xff]  ;;  %v1397_v53 = vld [vmem:[#allocation29_spill] sm:$0xff]  ;;  %v1400_v61 = vld [vmem:[#allocation22_spill] sm:$0xff] }
  0x58   : > { %v633_v26 = vadd.f32 %v533_v11, %v529_v13  ;;  %v613_v42 = vadd.f32 %v612_v17, %v536_v0  ;;  %v655_v38 = vadd.f32 %v654_v47, %v538_v36  ;;  %482 = vmatprep.subr.mxu1 %v331_v1  ;;  %v549_v11 = vmul.f32 %v1199_v56, %v1199_v56  ;;  %v1401_v0 = vld [vmem:[#allocation17_spill] sm:$0xff]  ;;  %v1404_v47 = vld [vmem:[#allocation14_spill] sm:$0xff] }
  0x59   : > { %v592_v25 = vadd.f32 %v591_v51, %v535_v4  ;;  %412 = vmatpush1.msra.mxu0 %v328_v2  ;;  %483 = vmatpush1.msra.mxu1 %v330_v24  ;;  %v553_v18 = vmul.f32 %v1181_v46, %v1181_v46  ;;  %v565_v46 = vmul.f32 %v1394_v45, %v1394_v45  ;;  %v1403_v36 = vld [vmem:[#allocation13_spill] sm:$0xff] }
  0x5a   : > { %v634_v52 = vadd.f32 %v633_v26, %v537_v14  ;;  %v614_v3 = vadd.f32 %v613_v42, %v540_v62  ;;  %v656_v6 = vadd.f32 %v655_v38, %v542_v63  ;;  %413 = vmatprep.subr.mxu0 %v1213_v31  ;;  %484 = vmatprep.subr.mxu1 %v327_v8  ;;  %v1402_v31 = vld [vmem:[#allocation18_spill] sm:$0xff] }
  0x5b   : > { %v593_v5 = vadd.f32 %v592_v25, %v539_v9  ;;  %v555_v9 = vmul.f32 %v1160_v37, %v1160_v37  ;;  %414 = vmatpush1.msra.mxu0 %v324_v7  ;;  %485 = vmatpush1.msra.mxu1 %v326_v12  ;;  %v559_v25 = vmul.f32 %v1150_v33, %v1150_v33 }
  0x5c   : > { %v635_v13 = vadd.f32 %v634_v52, %v541_v21  ;;  %v615_v4 = vadd.f32 %v614_v3, %v1201_v57  ;;  %v657_v14 = vadd.f32 %v656_v6, %v1203_v58  ;;  %v319_v21 = vld [vmem:[%s1336_s0] sm:$0xff]  ;;  %415 = vmatprep.subr.mxu0 %v321_v16  ;;  %486 = vmatprep.subr.mxu1 %v323_v15  ;;  %v1405_v3 = vld [vmem:[#allocation9_spill] sm:$0xff] }
  0x5d   : > { %v594_v17 = vadd.f32 %v593_v5, %v543_v22  ;;  %v557_v26 = vmul.f32 %v1167_v39, %v1167_v39  ;;  %416 = vmatpush1.msra.mxu0 %v1227_v20  ;;  %487 = vmatpush1.msra.mxu1 %v322_v10  ;;  %v564_v15 = vmul.f32 %v1132_v27, %v1132_v27  ;;  %v1393_v39 = vld [vmem:[#allocation30_spill] sm:$0xff]  ;;  %v1395_v27 = vld [vmem:[#allocation25_spill] sm:$0xff] }
  0x5e   : > { %v636_v19 = vadd.f32 %v635_v13, %v545_v44  ;;  %v616_v8 = vadd.f32 %v615_v4, %v1190_v50  ;;  %v658_v24 = vadd.f32 %v657_v14, %v1195_v54  ;;  %450 = vmatmul.mubr.f32.vlgmr.msra.gmra.mxu0 %v319_v21  ;;  %521 = vmatmul.mubr.f32.vlgmr.msra.gmra.mxu1 %v319_v21  ;;  %v1407_v4 = vld [vmem:[#allocation5_spill] sm:$0xff] }
  0x5f   : > { %v595_v22 = vadd.f32 %v594_v17, %v547_v30  ;;  %v566_v30 = vmul.f32 %v1135_v28, %v1135_v28  ;;  %v561_v33 = vmul.f32 %v1153_v34, %v1153_v34  ;;  %v563_v10 = vmul.f32 %v1140_v29, %v1140_v29  ;;  %v1396_v28 = vld [vmem:[#allocation28_spill] sm:$0xff] }
  0x60   : > { %v637_v7 = vadd.f32 %v636_v19, %v549_v11  ;;  %v617_v12 = vadd.f32 %v616_v8, %v1186_v48  ;;  %v659_v16 = vadd.f32 %v658_v24, %v1188_v49  ;;  %v567_v49 = vmul.f32 %v1395_v27, %v1395_v27 }
  0x61   : > { %v596_v37 = vadd.f32 %v595_v22, %v551_v23  ;;  %v569_v29 = vmul.f32 %v1398_v55, %v1398_v55  ;;  %v573_v62 = vmul.f32 %v1400_v61, %v1400_v61  ;;  %v575_v1 = vmul.f32 %v1401_v0, %v1401_v0  ;;  %v1406_v23 = vld [vmem:[#allocation10_spill] sm:$0xff] }
  0x62   : > { %v638_v38 = vadd.f32 %v637_v7, %v553_v18  ;;  %v618_v20 = vadd.f32 %v617_v12, %v1173_v43  ;;  %v660_v42 = vadd.f32 %v659_v16, %v1393_v39  ;;  %v1399_v43 = vld [vmem:[#allocation21_spill] sm:$0xff]  ;;  %v577_v32 = vmul.f32 %v1402_v31, %v1402_v31  ;;  %v1410_v7 = vld [vmem:[#allocation24_spill] sm:$0xff]  ;;  %v1411_v16 = vld [vmem:[#allocation19_spill] sm:$0xff] }
  0x63   : > { %v597_v44 = vadd.f32 %v596_v37, %v555_v9  ;;  %v571_v57 = vmul.f32 %v1399_v43, %v1399_v43  ;;  %v579_v40 = vmul.f32 %v1403_v36, %v1403_v36  ;;  %v581_v51 = vmul.f32 %v1404_v47, %v1404_v47  ;;  %v1408_v9 = vld [vmem:[#allocation6_spill] sm:$0xff]  ;;  %v1420_v43 = vld [vmem:[#allocation4_spill] sm:$0xff] }
  0x64   : > { %v639_v48 = vadd.f32 %v638_v38, %v557_v26  ;;  %v619_v50 = vadd.f32 %v618_v20, %v1396_v28  ;;  %v661_v34 = vadd.f32 %v660_v42, %v1397_v53  ;;  %v583_v6 = vmul.f32 %v1405_v3, %v1405_v3  ;;  %v1417_v28 = vld [vmem:[#allocation7_spill] sm:$0xff]  ;;  %v1418_v53 = vld [vmem:[#allocation8_spill] sm:$0xff] }
  0x65   : > { %v598_v54 = vadd.f32 %v597_v44, %v559_v25  ;;  %v585_v11 = vmul.f32 %v1406_v23, %v1406_v23  ;;  %v587_v14 = vmul.f32 %v1407_v4, %v1407_v4  ;;  %v589_v18 = vmul.f32 %v1408_v9, %v1408_v9  ;;  %v1409_v25 = vld [vmem:[#allocation23_spill] sm:$0xff] }
  0x66   : > { %v640_v56 = vadd.f32 %v639_v48, %v561_v33  ;;  %v620_v58 = vadd.f32 %v619_v50, %v564_v15  ;;  %v662_v59 = vadd.f32 %v661_v34, %v566_v30  ;;  %v568_v26 = vmul.f32 %v1409_v25, %v1409_v25  ;;  %v1412_v15 = vld [vmem:[#allocation20_spill] sm:$0xff]  ;;  %v1413_v33 = vld [vmem:[#allocation15_spill] sm:$0xff] }
  0x67   : > { %v599_v60 = vadd.f32 %v598_v54, %v563_v10  ;;  %v570_v12 = vmul.f32 %v1410_v7, %v1410_v7  ;;  %v572_v37 = vmul.f32 %v1411_v16, %v1411_v16  ;;  %v574_v30 = vmul.f32 %v1412_v15, %v1412_v15  ;;  %v1414_v10 = vld [vmem:[#allocation16_spill] sm:$0xff]  ;;  %v1415_v44 = vld [vmem:[#allocation11_spill] sm:$0xff] }
  0x68   : > { %v641_v63 = vadd.f32 %v640_v56, %v565_v46  ;;  %v576_v38 = vmul.f32 %v1413_v33, %v1413_v33  ;;  %v578_v20 = vmul.f32 %v1414_v10, %v1414_v10  ;;  %v621_v39 = vadd.f32 %v620_v58, %v568_v26  ;;  %v1416_v46 = vld [vmem:[#allocation12_spill] sm:$0xff] }
  0x69   : > { %v600_v2 = vadd.f32 %v599_v60, %v567_v49  ;;  %v663_v42 = vadd.f32 %v662_v59, %v570_v12  ;;  %v580_v45 = vmul.f32 %v1415_v44, %v1415_v44  ;;  %v582_v48 = vmul.f32 %v1416_v46, %v1416_v46 }
  0x6a   : > { %v642_v35 = vadd.f32 %v641_v63, %v569_v29  ;;  %v622_v27 = vadd.f32 %v621_v39, %v572_v37  ;;  %v584_v50 = vmul.f32 %v1417_v28, %v1417_v28  ;;  %v586_v34 = vmul.f32 %v1418_v53, %v1418_v53  ;;  %v1419_v29 = vld [vmem:[#allocation3_spill] sm:$0xff] }
  0x6b   : > { %v601_v41 = vadd.f32 %v600_v2, %v571_v57  ;;  %v664_v49 = vadd.f32 %v663_v42, %v574_v30  ;;  %v588_v56 = vmul.f32 %v1419_v29, %v1419_v29  ;;  %v590_v57 = vmul.f32 %v1420_v43, %v1420_v43 }
  0x6c   : > { %v643_v52 = vadd.f32 %v642_v35, %v573_v62  ;;  %v623_v54 = vadd.f32 %v622_v27, %v576_v38 }
  0x6d   : > { %v602_v5 = vadd.f32 %v601_v41, %v575_v1  ;;  %v665_v55 = vadd.f32 %v664_v49, %v578_v20 }
  0x6e   : > { %v644_v13 = vadd.f32 %v643_v52, %v577_v32  ;;  %v624_v58 = vadd.f32 %v623_v54, %v580_v45 }
  0x6f   : > { %v603_v17 = vadd.f32 %v602_v5, %v579_v40  ;;  %v666_v59 = vadd.f32 %v665_v55, %v582_v48 }
  0x70   : > { %v645_v19 = vadd.f32 %v644_v13, %v581_v51  ;;  %v625_v60 = vadd.f32 %v624_v58, %v584_v50 }
  0x71   : > { %v604_v21 = vadd.f32 %v603_v17, %v583_v6  ;;  %v667_v61 = vadd.f32 %v666_v59, %v586_v34 }
  0x72   : > { %v646_v8 = vadd.f32 %v645_v19, %v585_v11  ;;  %v626_v62 = vadd.f32 %v625_v60, %v588_v56 }
  0x73   : > { %v605_v24 = vadd.f32 %v604_v21, %v587_v14  ;;  %v668_v63 = vadd.f32 %v667_v61, %v590_v57 }
  0x74   : > { %v647_v22 = vadd.f32 %v646_v8, %v589_v18  ;;  %v627_v2 = vrot.slane %v626_v62, 4 }
  0x75   : > { %v606_v0 = vrot.slane %v605_v24, 4  ;;  %v669_v31 = vrot.slane %v668_v63, 4 }
  0x76   : > { %v648_v1 = vrot.slane %v647_v22, 4  ;;  %v628_v36 = vadd.f32 %v627_v2, %v626_v62 }
  0x77   : > { %v607_v32 = vadd.f32 %v606_v0, %v605_v24  ;;  %v670_v40 = vadd.f32 %v669_v31, %v668_v63 }
  0x78   : > { %v649_v35 = vadd.f32 %v648_v1, %v647_v22  ;;  %v629_v51 = vrot.slane %v628_v36, 2 }
  0x79   : > { %v608_v41 = vrot.slane %v607_v32, 2  ;;  %v671_v52 = vrot.slane %v670_v40, 2 }
  0x7a   : > { %v650_v47 = vrot.slane %v649_v35, 2  ;;  %v630_v5 = vadd.f32 %v629_v51, %v628_v36 }
  0x7b   : > { %v609_v3 = vadd.f32 %v608_v41, %v607_v32  ;;  %v672_v23 = vadd.f32 %v671_v52, %v670_v40 }
  0x7c   : > { %v651_v6 = vadd.f32 %v650_v47, %v649_v35  ;;  %v631_v4 = vrot.slane %v630_v5, 1 }
  0x7d   : > { %v610_v11 = vrot.slane %v609_v3, 1  ;;  %v673_v14 = vrot.slane %v672_v23, 1 }
  0x7e   : > { %v652_v13 = vrot.slane %v651_v6, 1  ;;  %v632_v24 = vadd.f32 %v631_v4, %v630_v5 }
  0x7f   : > { %v611_v17 = vadd.f32 %v610_v11, %v609_v3  ;;  %v674_v22 = vadd.f32 %v673_v14, %v672_v23 }
  0x80   : > { %v653_v9 = vadd.f32 %v652_v13, %v651_v6 }
  0xb7   : > { %v686_v25 = vpop.permute.xlu0 %685 }
 0x11e   : > { %v451_v18 = vpop.f32.mrf.mxu0  ;;  %v522_v19 = vpop.f32.mrf.mxu1 }
 0x11f   : > { %v675_v21 = vmul.f32 2.0, %v451_v18  ;;  %v677_v8 = vmul.f32 2.0, %v522_v19 }
 0x120   : > { %v453_v26 = vpop.f32.mrf.mxu0  ;;  %v524_v7 = vpop.f32.mrf.mxu1 }
 0x121   : > { %v679_v12 = vsub.f32 %v611_v17, %v675_v21  ;;  %v681_v16 = vsub.f32 %v653_v9, %v677_v8  ;;  %v676_v37 = vmul.f32 2.0, %v453_v26  ;;  %v678_v15 = vmul.f32 2.0, %v524_v7 }
 0x123   : > { %v680_v30 = vsub.f32 %v632_v24, %v676_v37  ;;  %v682_v33 = vsub.f32 %v674_v22, %v678_v15  ;;  %v688_v38 = vadd.f32 %v686_v25, %v679_v12  ;;  %v690_v10 = vadd.f32 %v686_v25, %v681_v16 }
 0x125   : > { %v689_v20 = vadd.f32 %v686_v25, %v680_v30  ;;  %v691_v39 = vadd.f32 %v686_v25, %v682_v33  ;;  %v692_v42 = vmul.f32 -0.5, %v688_v38  ;;  %v694_v44 = vmul.f32 -0.5, %v690_v10 }
 0x127   : > { %v693_v45 = vmul.f32 -0.5, %v689_v20  ;;  %v695_v46 = vmul.f32 -0.5, %v691_v39  ;;  %v696_v48 = vmul.f32 1.442695, %v692_v42  ;;  %v700_v27 = vmul.f32 1.442695, %v694_v44 }
 0x129   : > { %811 = vpow2.f32 %v696_v48  ;;  %v698_v49 = vmul.f32 1.442695, %v693_v45  ;;  %v702_v28 = vmul.f32 1.442695, %v695_v46 }
 0x12b   : > { %813 = vpow2.f32 %v698_v49 }
 0x12c   : > { %815 = vpow2.f32 %v700_v27 }
 0x12d   : > { %817 = vpow2.f32 %v702_v28 }
 0x136   : > { %v812_v50 = vpop.eup %811 }
 0x137   : > { %704 = vst [vmem:[%s317_s11] sm:$0xff] %v812_v50 }
 0x138   : > { %v814_v53 = vpop.eup %813 }
 0x139   : > { %v816_v34 = vpop.eup %815  ;;  %705 = vst [vmem:[%s317_s11 + $0x8] sm:$0xff] %v814_v53 }
 0x13a   : > { %v818_v54 = vpop.eup %817  ;;  %706 = vst [vmem:[%s317_s11 + $0x10] sm:$0xff] %v816_v34 }
 0x13b   : > { %707 = vst [vmem:[%s317_s11 + $0x18] sm:$0xff] %v818_v54 }
 0x13c PF: > { %p10_p9 = scmp.ge.s32.totalorder %s882_s16, 4   ;;  %s1421_s12 = smov %s837_s13 }
 0x13d   : > { %s1422_s13 = smov %s891_s19  ;;  %s1423_s14 = smov %s882_s16 }
 0x13e   :  { %12 = sbr.rel (!%p10_p9) target bundleno = 2 (0x2), region = 90 }

</bundles_post_ra>
